<compile_context>
chip_gen: v5e
topology: v5e:2x2
jax: 0.10.0
libtpu: 0.0.40
codegen_flags: <defaults>
</compile_context>

<pallas_src>
import functools

import jax
import jax.numpy as jnp
from jax.experimental import pallas as pl
from jax.experimental.pallas import tpu as pltpu


def _round_up(x, m):
    return ((x + m - 1) // m) * m


def _softplus(x):
    # Matches torch.nn.Softplus(beta=1, threshold=20): linear above threshold,
    # numerically-stable log1p(exp(x)) below (argument clamped so the unused
    # where-branch cannot overflow).
    safe = jnp.minimum(x, 20.0)
    return jnp.where(x > 20.0, x, jnp.log1p(jnp.exp(safe)))


def evidence_kernel(x_ref, w1_ref, w2_ref, w3_ref, b_ref, o_ref, *, h1, h2):
    # Packed biases: row 0 = b1 (width h1), row 1 = b2 (width h2), row 2 = b3.
    bias = b_ref[...]                                # (3, W) f32
    b1 = bias[0:1, :h1]
    b2 = bias[1:2, :h2]
    b3 = bias[2:3, :o_ref.shape[1]]

    # In-kernel cast of the streamed x tile (no-op when compute dtype is f32).
    x = x_ref[...].astype(w1_ref.dtype)

    # Hidden layer 1: Linear + ReLU   (Dropout == identity in eval mode)
    h = jnp.dot(x, w1_ref[...], preferred_element_type=jnp.float32)
    h = jnp.maximum(h + b1, 0.0)
    # Hidden layer 2: Linear + ReLU
    h = jnp.dot(h.astype(w2_ref.dtype), w2_ref[...],
                preferred_element_type=jnp.float32)
    h = jnp.maximum(h + b2, 0.0)
    # Output head: Linear + Softplus (true class width; masked vst is cheap,
    # HBM bytes are what matter here).
    o = jnp.dot(h.astype(w3_ref.dtype), w3_ref[...],
                preferred_element_type=jnp.float32)
    o_ref[...] = _softplus(o + b3)


def _choose_tile(batch, block_m):
    """Batch-tile size: big (amortize step overhead) but >=~4 grid steps for
    large batches so the 'parallel' axis can shard over v7x's 2 TensorCores."""
    tm = min(block_m, _round_up(batch, 8))
    if tm > 128:  # only split when per-step overhead is already well amortized
        target = _round_up(-(-batch // 4), 8)  # ~4 grid steps
        tm = max(128, min(tm, target))
    return tm


@functools.partial(jax.jit, static_argnames=("block_m", "compute_dtype"))
def evidence_collector(x, w1, b1, w2, b2, w3, b3, *, block_m=2048,
                       compute_dtype=jnp.float32):
    """Forward of EvidenceCollector(dims=[D_in, H1, H2], num_classes=C).

    Weights are stored [fan_in, fan_out] (transposed nn.Linear.weight), biases
    are [1, fan_out]. Returns f32 [B, C].
    """
    B, d_in = x.shape
    h1 = w1.shape[1]
    h2 = w2.shape[1]
    c = w3.shape[1]
    wbias = max(h1, h2, c)  # packed-bias buffer width

    # Pack the three biases into one f32 buffer (one spec instead of three).
    bias = jnp.zeros((3, wbias), jnp.float32)
    bias = bias.at[0, :h1].set(b1.reshape(-1).astype(jnp.float32))
    bias = bias.at[1, :h2].set(b2.reshape(-1).astype(jnp.float32))
    bias = bias.at[2, :c].set(b3.reshape(-1).astype(jnp.float32))

    # Weights are tiny -> cast once here (no-op for the f32 default).
    w1_c = w1.astype(compute_dtype)
    w2_c = w2.astype(compute_dtype)
    w3_c = w3.astype(compute_dtype)

    tm = _choose_tile(B, block_m)
    grid = (pl.cdiv(B, tm),)

    wbytes = jnp.dtype(compute_dtype).itemsize
    cost = pl.CostEstimate(
        flops=2 * B * (d_in * h1 + h1 * h2 + h2 * c),
        transcendentals=2 * B * c,  # exp + log1p per output element
        bytes_accessed=(B * d_in * x.dtype.itemsize      # x stream
                        + B * c * 4                       # output
                        + (d_in * h1 + h1 * h2 + h2 * c) * wbytes
                        + 3 * wbias * 4),
    )

    kernel = functools.partial(evidence_kernel, h1=h1, h2=h2)
    out = pl.pallas_call(
        kernel,
        out_shape=jax.ShapeDtypeStruct((B, c), jnp.float32),
        grid=grid,
        in_specs=[
            pl.BlockSpec((tm, d_in), lambda i: (i, 0)),    # streamed x tiles
            pl.BlockSpec((d_in, h1), lambda i: (0, 0)),    # VMEM-resident
            pl.BlockSpec((h1, h2), lambda i: (0, 0)),      # VMEM-resident
            pl.BlockSpec((h2, c), lambda i: (0, 0)),       # VMEM-resident
            pl.BlockSpec((3, wbias), lambda i: (0, 0)),    # packed biases
        ],
        out_specs=pl.BlockSpec((tm, c), lambda i: (i, 0)),
        compiler_params=pltpu.CompilerParams(
            dimension_semantics=("parallel",),  # v7x: shard batch tiles over TCs
        ),
        cost_estimate=cost,
    )(x, w1_c, w2_c, w3_c, bias)
    return out


def init_linear(key, fan_in, fan_out):
    # Deterministic init mimicking torch.nn.Linear defaults (uniform +-1/sqrt(fan_in)).
    kw, kb = jax.random.split(key)
    bound = 1.0 / (fan_in ** 0.5)
    w = jax.random.uniform(kw, (fan_in, fan_out), jnp.float32, -bound, bound)
    b = jax.random.uniform(kb, (1, fan_out), jnp.float32, -bound, bound)
    return w, b


def reference_f32(x, w1, b1, w2, b2, w3, b3):
    hp = jax.lax.Precision.HIGHEST
    h = jnp.maximum(jnp.dot(x, w1, precision=hp) + b1, 0.0)
    h = jnp.maximum(jnp.dot(h, w2, precision=hp) + b2, 0.0)
    return jax.nn.softplus(jnp.dot(h, w3, precision=hp) + b3)


if __name__ == "__main__":
    # dims = [32, 64, 32], num_classes = 8, batch = 8 (small demo shapes)
    dims = [32, 64, 32]
    num_classes = 8
    B = 8

    key = jax.random.PRNGKey(0)
    kx, k1, k2, k3 = jax.random.split(key, 4)

    x = jax.random.normal(kx, (B, dims[0]), jnp.float32)
    w1, b1 = init_linear(k1, dims[0], dims[1])
    w2, b2 = init_linear(k2, dims[1], dims[2])
    w3, b3 = init_linear(k3, dims[2], num_classes)

    out = evidence_collector(x, w1, b1, w2, b2, w3, b3)
    out = jax.block_until_ready(out)
    assert out.shape == (B, num_classes)
    assert bool(jnp.isfinite(out).all())
    assert bool(jnp.all(out >= 0.0))  # softplus output is positive

    # f32 kernel vs high-precision f32 reference (tolerance covers any internal
    # MXU pass-decomposition differences).
    ref = reference_f32(x, w1, b1, w2, b2, w3, b3)
    assert jnp.allclose(out, ref, atol=2e-2, rtol=2e-2)

    # Exercise the clipped-grid path: grid > 1, B not a multiple of the tile,
    # last block partially out-of-bounds (reads clipped/garbage rows, writes
    # dropped for those rows).
    B2 = 600
    x2 = jax.random.normal(jax.random.PRNGKey(1), (B2, dims[0]), jnp.float32)
    out2 = jax.block_until_ready(evidence_collector(x2, w1, b1, w2, b2, w3, b3))
    ref2 = reference_f32(x2, w1, b1, w2, b2, w3, b3)
    assert out2.shape == (B2, num_classes)
    assert bool(jnp.isfinite(out2).all())
    assert jnp.allclose(out2, ref2, atol=2e-2, rtol=2e-2)

    print("KERNEL_OK")
</pallas_src>

<mosaic_0001>
module attributes {stable_mosaic.version = 11 : i64} {
  func.func @evidence_kernel(%arg0: i32, %arg1: memref<8x32xf32, #tpu.memory_space<vmem>>, %arg2: memref<32x64xf32, #tpu.memory_space<vmem>>, %arg3: memref<64x32xf32, #tpu.memory_space<vmem>>, %arg4: memref<32x8xf32, #tpu.memory_space<vmem>>, %arg5: memref<3x64xf32, #tpu.memory_space<vmem>>, %arg6: memref<8x8xf32, #tpu.memory_space<vmem>>) attributes {dimension_semantics = [#tpu.dimension_semantics<parallel>], iteration_bounds = array<i64: 1>, scalar_prefetch = 0 : i64, scratch_operands = 0 : i64, tpu.core_type = #tpu.core_type<tc>, window_params = [{transform_indices = @transform_0, window_bounds = array<i64: 8, 32>}, {pipeline_mode = #tpu.pipeline_mode<synchronous>, transform_indices = @transform_1, window_bounds = array<i64: 32, 64>}, {pipeline_mode = #tpu.pipeline_mode<synchronous>, transform_indices = @transform_2, window_bounds = array<i64: 64, 32>}, {pipeline_mode = #tpu.pipeline_mode<synchronous>, transform_indices = @transform_3, window_bounds = array<i64: 32, 8>}, {pipeline_mode = #tpu.pipeline_mode<synchronous>, transform_indices = @transform_4, window_bounds = array<i64: 3, 64>}, {transform_indices = @transform_5, window_bounds = array<i64: 8, 8>}]} {
    %c0 = arith.constant 0 : index
    %c0_0 = arith.constant 0 : index
    %0 = vector.load %arg5[%c0, %c0_0] : memref<3x64xf32, #tpu.memory_space<vmem>>, vector<3x64xf32>
    %1 = vector.extract_strided_slice %0 {offsets = [0, 0], sizes = [1, 64], strides = [1, 1]} : vector<3x64xf32> to vector<1x64xf32>
    %2 = vector.extract_strided_slice %0 {offsets = [1, 0], sizes = [1, 32], strides = [1, 1]} : vector<3x64xf32> to vector<1x32xf32>
    %3 = vector.extract_strided_slice %0 {offsets = [2, 0], sizes = [1, 8], strides = [1, 1]} : vector<3x64xf32> to vector<1x8xf32>
    %c0_1 = arith.constant 0 : index
    %c0_2 = arith.constant 0 : index
    %4 = vector.load %arg1[%c0_1, %c0_2] : memref<8x32xf32, #tpu.memory_space<vmem>>, vector<8x32xf32>
    %c0_3 = arith.constant 0 : index
    %c0_4 = arith.constant 0 : index
    %5 = vector.load %arg2[%c0_3, %c0_4] : memref<32x64xf32, #tpu.memory_space<vmem>>, vector<32x64xf32>
    %cst = arith.constant dense<0.000000e+00> : vector<8x64xf32>
    %6 = tpu.matmul %4, %5, %cst {dimension_numbers = #tpu.dot_dimension_numbers<[1], [0], [0], [1], [0, 0, 1, 1], [], []>} : vector<8x32xf32>, vector<32x64xf32>, vector<8x64xf32> -> vector<8x64xf32>
    %7 = vector.broadcast %1 : vector<1x64xf32> to vector<8x64xf32>
    %8 = arith.addf %6, %7 : vector<8x64xf32>
    %cst_5 = arith.constant 0.000000e+00 : f32
    %9 = vector.broadcast %cst_5 : f32 to vector<8x64xf32>
    %10 = arith.maximumf %8, %9 : vector<8x64xf32>
    %c0_6 = arith.constant 0 : index
    %c0_7 = arith.constant 0 : index
    %11 = vector.load %arg3[%c0_6, %c0_7] : memref<64x32xf32, #tpu.memory_space<vmem>>, vector<64x32xf32>
    %cst_8 = arith.constant dense<0.000000e+00> : vector<8x32xf32>
    %12 = tpu.matmul %10, %11, %cst_8 {dimension_numbers = #tpu.dot_dimension_numbers<[1], [0], [0], [1], [0, 0, 1, 1], [], []>} : vector<8x64xf32>, vector<64x32xf32>, vector<8x32xf32> -> vector<8x32xf32>
    %13 = vector.broadcast %2 : vector<1x32xf32> to vector<8x32xf32>
    %14 = arith.addf %12, %13 : vector<8x32xf32>
    %cst_9 = arith.constant 0.000000e+00 : f32
    %15 = vector.broadcast %cst_9 : f32 to vector<8x32xf32>
    %16 = arith.maximumf %14, %15 : vector<8x32xf32>
    %c0_10 = arith.constant 0 : index
    %c0_11 = arith.constant 0 : index
    %17 = vector.load %arg4[%c0_10, %c0_11] : memref<32x8xf32, #tpu.memory_space<vmem>>, vector<32x8xf32>
    %cst_12 = arith.constant dense<0.000000e+00> : vector<8x8xf32>
    %18 = tpu.matmul %16, %17, %cst_12 {dimension_numbers = #tpu.dot_dimension_numbers<[1], [0], [0], [1], [0, 0, 1, 1], [], []>} : vector<8x32xf32>, vector<32x8xf32>, vector<8x8xf32> -> vector<8x8xf32>
    %19 = vector.broadcast %3 : vector<1x8xf32> to vector<8x8xf32>
    %20 = arith.addf %18, %19 : vector<8x8xf32>
    %cst_13 = arith.constant 2.000000e+01 : f32
    %21 = vector.broadcast %cst_13 : f32 to vector<8x8xf32>
    %22 = arith.minimumf %20, %21 : vector<8x8xf32>
    %cst_14 = arith.constant 2.000000e+01 : f32
    %23 = vector.broadcast %cst_14 : f32 to vector<8x8xf32>
    %24 = arith.cmpf ogt, %20, %23 : vector<8x8xf32>
    %25 = math.exp %22 : vector<8x8xf32>
    %26 = math.log1p %25 : vector<8x8xf32>
    %27 = arith.select %24, %20, %26 : vector<8x8xi1>, vector<8x8xf32>
    %c0_15 = arith.constant 0 : index
    %c0_16 = arith.constant 0 : index
    %28 = vector.load %arg6[%c0_15, %c0_16] : memref<8x8xf32, #tpu.memory_space<vmem>>, vector<8x8xf32>
    tpu.vector_store %arg6[%c0_15, %c0_16], %27 {strides = array<i32>} : memref<8x8xf32, #tpu.memory_space<vmem>>, vector<8x8xf32>,
    return
  }
  func.func @transform_0(%arg0: i32) -> (i32, i32) {
    %c0_i32 = arith.constant 0 : i32
    %c0_i32_0 = arith.constant 0 : i32
    return %arg0, %c0_i32 : i32, i32
  }
  func.func @transform_1(%arg0: i32) -> (i32, i32) {
    %c0_i32 = arith.constant 0 : i32
    %c0_i32_0 = arith.constant 0 : i32
    %c0_i32_1 = arith.constant 0 : i32
    return %c0_i32, %c0_i32_0 : i32, i32
  }
  func.func @transform_2(%arg0: i32) -> (i32, i32) {
    %c0_i32 = arith.constant 0 : i32
    %c0_i32_0 = arith.constant 0 : i32
    %c0_i32_1 = arith.constant 0 : i32
    return %c0_i32, %c0_i32_0 : i32, i32
  }
  func.func @transform_3(%arg0: i32) -> (i32, i32) {
    %c0_i32 = arith.constant 0 : i32
    %c0_i32_0 = arith.constant 0 : i32
    %c0_i32_1 = arith.constant 0 : i32
    return %c0_i32, %c0_i32_0 : i32, i32
  }
  func.func @transform_4(%arg0: i32) -> (i32, i32) {
    %c0_i32 = arith.constant 0 : i32
    %c0_i32_0 = arith.constant 0 : i32
    %c0_i32_1 = arith.constant 0 : i32
    return %c0_i32, %c0_i32_0 : i32, i32
  }
  func.func @transform_5(%arg0: i32) -> (i32, i32) {
    %c0_i32 = arith.constant 0 : i32
    %c0_i32_0 = arith.constant 0 : i32
    return %arg0, %c0_i32 : i32, i32
  }
}

</mosaic_0001>

<bundles_post_ra>
// kernel: evidence_collector.1
= control target key start
LH: loop header
LB: loop body
LE: loop exit
PB: predicated region body
PF: predicated region fallthrough
CT: control target
= control target key end

     0   :  { %s271_s0 = inlined_call_operand.vmem [shape: f32[8,32], index: 0, kind: input, shape index: {}]   ;;  %s272_s1 = inlined_call_operand.vmem [shape: f32[32,64], index: 1, kind: input, shape index: {}]   ;;  %s273_s2 = inlined_call_operand.vmem [shape: f32[64,32], index: 2, kind: input, shape index: {}]   ;;  %s274_s3 = inlined_call_operand.vmem [shape: f32[32,8], index: 3, kind: input, shape index: {}]   ;;  %s275_s4 = inlined_call_operand.vmem [shape: f32[3,64], index: 4, kind: input, shape index: {}]   ;;  %s276_s5 = inlined_call_operand.hbm [shape: f32[8,8], index: 5, kind: output, shape index: {}]  }
   0x1   :  { %v26_v0 = vld [vmem:[%s272_s1 + $0x18] sm:$0xff]  ;;  %v25_v1 = vld [vmem:[%s272_s1 + $0x10] sm:$0xff]  ;;  %v24_v3 = vld [vmem:[%s272_s1 + $0x8] sm:$0xff] }
   0x2   :  { %44 = vmatpush.msra.mxu0 %v26_v0  ;;  %v60_v2 = vld [vmem:[%s273_s2 + $0x38] sm:$0xff]  ;;  %v59_v4 = vld [vmem:[%s273_s2 + $0x30] sm:$0xff]  ;;  %v58_v5 = vld [vmem:[%s273_s2 + $0x28] sm:$0xff] }
   0x3   :  { %74 = vmatpush.msra.mxu1 %v60_v2 }
   0x4   :  { %45 = vmatpush.msra.mxu0 %v25_v1 }
   0x5   :  { %10 = vsyncpa [#allocation3], 0  ;;  %v23_v6 = vld [vmem:[%s272_s1] sm:$0xff]  ;;  %75 = vmatpush.msra.mxu1 %v59_v4  ;;  %vm28_vm0 = vcmask 261120   ;;  %v56_v9 = vld [vmem:[%s273_s2 + $0x18] sm:$0xff]  ;;  %vm62_vm1 = vcmask 523264  }
   0x6   :  { %46 = vmatpush.msra.mxu0 %v24_v3  ;;  %v22_v7 = vld [vmem:[%s271_s0] sm:$0xff]  ;;  %v55_v10 = vld [vmem:[%s273_s2 + $0x10] sm:$0xff]  ;;  %v54_v11 = vld [vmem:[%s273_s2 + $0x8] sm:$0xff]  ;;  %s138_s28 = sshll.u32 %s276_s5, 4  ;;  %vm129_vm3 = vcmask 64512   ;;  %s139_s28 = int_to_ptr.hbm [resolvable:$true] %s138_s28 }
   0x7   :  { %v57_v8 = vld [vmem:[%s273_s2 + $0x20] sm:$0xff]  ;;  %76 = vmatpush.msra.mxu1 %v58_v5  ;;  %v90_v13 = vld [vmem:[%s274_s3 + $0x18] sm:$0xff]  ;;  %v89_v19 = vld [vmem:[%s274_s3 + $0x10] sm:$0xff] }
   0x8   :  { %47 = vmatpush.msra.mxu0 %v23_v6  ;;  %v53_v12 = vld [vmem:[%s273_s2] sm:$0xff]  ;;  %107 = vmatpush.msra.mxu2 %v90_v13  ;;  %v88_v20 = vld [vmem:[%s274_s3 + $0x8] sm:$0xff] }
   0x9   :  { %147 = vmatmul.msk.f32.vlgmr.msra.gmra.mxu0 %vm28_vm0, %v22_v7  ;;  %77 = vmatpush.msra.mxu1 %v57_v8  ;;  %v21_v14 = vld [vmem:[%s275_s4] sm:$0x7] }
   0xa   :  { %v27_v15 = vperm.slane %v21_v14, 0  ;;  %108 = vmatpush.msra.mxu2 %v89_v19  ;;  %v87_v21 = vld [vmem:[%s274_s3] sm:$0xff]  ;;  %v61_v22 = vperm.slane %v21_v14, 1  ;;  %v91_v26 = vperm.slane %v21_v14, 2  ;;  %s181_s3 = smov [#allocation2]  }
   0xb   :  { %78 = vmatpush.msra.mxu1 %v56_v9  ;;  %s136_s4 = sshll.u32 %s181_s3, 4  ;;  %s137_s4 = int_to_ptr.vmem [resolvable:$true] %s136_s4 }
   0xc   :  { %109 = vmatpush.msra.mxu2 %v88_v20 }
   0xd   :  { %79 = vmatpush.msra.mxu1 %v55_v10 }
   0xe   :  { %110 = vmatpush.msra.mxu2 %v87_v21 }
   0xf   :  { %80 = vmatpush.msra.mxu1 %v54_v11 }
  0x11   :  { %81 = vmatpush.msra.mxu1 %v53_v12 }
  0x86   :  { %v49_v16 = vpop.f32.mrf.mxu0 }
  0x87   :  { %v50_v17 = vadd.f32 %v49_v16, %v27_v15 }
  0x89   :  { %v52_v18 = vmax.f32 %v50_v17, 0.0 }
  0x8b   :  { %148 = vmatmul.msk.f32.vlgmr.msra.gmra.mxu1 %vm62_vm1, %v52_v18 }
 0x108   :  { %v83_v23 = vpop.f32.mrf.mxu1 }
 0x109   :  { %v84_v24 = vadd.f32 %v83_v23, %v61_v22 }
 0x10b   :  { %v86_v25 = vmax.f32 %v84_v24, 0.0 }
 0x10d   :  { %149 = vmatmul.msk.f32.vlgmr.msra.gmra.mxu2 %vm28_vm0, %v86_v25 }
 0x190   :  { %v112_v27 = vpop.f32.mrf.mxu2 }
 0x191   :  { %v113_v28 = vadd.f32 %v112_v27, %v91_v26 }
 0x193   :  { %v115_v29 = vmin.f32 %v113_v28, 20.0  ;;  %vm116_vm4 = vcmp.gt.f32.partialorder %v113_v28, 20.0 }
 0x195   :  { %v117_v30 = vmul.f32 1.442695, %v115_v29 }
 0x197   :  { %151 = vpow2.f32 %v117_v30 }
 0x19d   :  { %v152_v31 = vpop.eup %151 }
 0x19e   :  { %v119_v32 = vadd.f32 1.0, %v152_v31  ;;  %v122_v33 = vmul.f32 -0.5, %v152_v31  ;;  %v125_v35 = vand.u32 2147483647, %v152_v31 }
 0x1a0   :  { %153 = vlog2.f32 %v119_v32  ;;  %v123_v34 = vadd.f32 1.0, %v122_v33  ;;  %vm126_vm2 = vcmp.lt.f32.partialorder %v125_v35, 0.0004427343 }
 0x1a2   :  { %v124_v38 = vmul.f32 %v152_v31, %v123_v34 }
 0x1a6   :  { %v154_v36 = vpop.eup %153 }
 0x1a7   :  { %v121_v37 = vmul.f32 0.6931472, %v154_v36 }
 0x1a9   :  { %v127_v39 = vsel %vm126_vm2, %v124_v38, %v121_v37 }
 0x1aa   :  { %v128_v40 = vsel %vm116_vm4, %v113_v28, %v127_v39 }
 0x1ab   :  { %130 = vst.msk [vmem:[#allocation2] sm:$0xff] %vm129_vm3, %v128_v40 }
 0x1ac   :  { %141 = dma.vmem_to_hbm [thread:$0]  %s137_s4, 128, %s139_s28, [#allocation3]  }
 0x1ad   :  { %179 = dma.done.wait [#allocation3], 128  }
 0x1ae   :  { %180 = vsyncadd [#allocation3], 4294967168 }
 0x1af   :  { %146 = vsyncpa [#allocation3], 1 }

</bundles_post_ra>
